<compile_context>
chip_gen: v5e
topology: v5e:2x2
jax: 0.10.0
libtpu: 0.0.40
codegen_flags: <defaults>
</compile_context>

<pallas_src>
import numpy as np
import jax
import jax.numpy as jnp
from jax.experimental import pallas as pl
from jax.experimental.pallas import tpu as pltpu

SMALL_NEGATIVE = -1e4  # cfg.small_negative stand-in (pad value for token embs)


def _vmem_limit_bytes():
    # Explicit scoped-VMEM budget (matters on v7x where physical VMEM is 64 MiB);
    # fall back to the compiler default if the hardware query is unavailable.
    try:
        cap = pltpu.get_tpu_info().vmem_capacity_bytes
        return int(min(64 * 2 ** 20, cap * 3 // 4))
    except Exception:
        return None


_VMEM_LIMIT = _vmem_limit_bytes()


def _compiler_params(dims):
    return pltpu.CompilerParams(dimension_semantics=dims,
                                vmem_limit_bytes=_VMEM_LIMIT)


# ----------------------------- Pallas kernels -----------------------------

def _linear_kernel(x_ref, w_ref, b_ref, o_ref):
    # bf16 operands on the MXU, f32 accumulation.
    o_ref[...] = (jnp.dot(x_ref[...].astype(jnp.bfloat16),
                          w_ref[...].astype(jnp.bfloat16),
                          preferred_element_type=jnp.float32)
                  + b_ref[...])


def pallas_linear(x, w_t, b, tm_max=512):
    """nn.Linear semantics: y = x @ W^T + b, with w_t = W^T of shape (K, N).

    Tiled over rows (M) so the block pipeline double-buffers the activations
    while the weights/bias stay resident in VMEM."""
    M, K = x.shape
    _, N = w_t.shape
    tm = M if M <= tm_max else tm_max
    # TODO(synk): add a K-reduction grid axis (accumulator scratch) if K grows >~2k.
    return pl.pallas_call(
        _linear_kernel,
        out_shape=jax.ShapeDtypeStruct((M, N), jnp.float32),
        grid=(pl.cdiv(M, tm),),
        in_specs=[pl.BlockSpec((tm, K), lambda i: (i, 0)),
                  pl.BlockSpec((K, N), lambda i: (0, 0)),    # weights resident
                  pl.BlockSpec((1, N), lambda i: (0, 0))],   # bias resident
        out_specs=pl.BlockSpec((tm, N), lambda i: (i, 0)),
        compiler_params=_compiler_params(("parallel",)),
    )(x, w_t, b.reshape(1, N))


def _mip_head_kernel(x_ref, w1_ref, b1_ref, w2_ref, b2_ref, o_ref):
    # tanh(MIP_Linear(x)) then the bilinear classifier (dropout = identity in eval)
    h = jnp.tanh(jnp.dot(x_ref[...].astype(jnp.bfloat16),
                         w1_ref[...].astype(jnp.bfloat16),
                         preferred_element_type=jnp.float32) + b1_ref[...])
    o_ref[...] = (jnp.dot(h.astype(jnp.bfloat16),
                          w2_ref[...].astype(jnp.bfloat16),
                          preferred_element_type=jnp.float32) + b2_ref[...])


def pallas_mip_head(rep, w1_t, b1, w2_t, b2, tp_max=512):
    """Fused MIP_Linear + tanh + bilinear, tiled over pairs (P).

    The classifier output dim is padded up to a multiple of 128 lanes so the
    logits store is a full (unmasked) vector store; the pad is sliced off."""
    P, K1 = rep.shape
    _, H = w1_t.shape
    _, R = w2_t.shape
    Rp = ((R + 127) // 128) * 128
    if Rp != R:
        w2_t = jnp.zeros((H, Rp), w2_t.dtype).at[:, :R].set(w2_t)
        b2 = jnp.zeros((Rp,), b2.dtype).at[:R].set(b2)
    tp = P if P <= tp_max else tp_max
    out = pl.pallas_call(
        _mip_head_kernel,
        out_shape=jax.ShapeDtypeStruct((P, Rp), jnp.float32),
        grid=(pl.cdiv(P, tp),),
        in_specs=[pl.BlockSpec((tp, K1), lambda i: (i, 0)),
                  pl.BlockSpec((K1, H), lambda i: (0, 0)),
                  pl.BlockSpec((1, H), lambda i: (0, 0)),
                  pl.BlockSpec((H, Rp), lambda i: (0, 0)),
                  pl.BlockSpec((1, Rp), lambda i: (0, 0))],
        out_specs=pl.BlockSpec((tp, Rp), lambda i: (i, 0)),
        compiler_params=_compiler_params(("parallel",)),
    )(rep, w1_t, b1.reshape(1, H), w2_t, b2.reshape(1, Rp))
    return out[:, :R]


def pallas_entity_pool(token_embs_e, att_mean, pos_flat, valid_flat, ent_did,
                       n_ent, max_ment):
    """Fused per-entity pooling, driven by scalar-prefetched doc ids and mention
    positions (no padded copies of the token/attention tensors, no XLA gather):

      entity_embs[n] = logsumexp_m token_embs_e[did[n], pos[n, m]]          (N_ent, E)
      ctx_raw[n]     = (sum_{valid m} att_mean[did[n], pos[n, m]]) @ token_embs_e[did[n]]

    Padded mention slots behave exactly like the reference's SMALL_NEGATIVE /
    zero pad rows.  The per-doc (S, E) and (S, S) blocks are DMA'd once per doc
    (Pallas elides the copy while did[n] is unchanged); individual mention rows
    are picked with dynamic VMEM slices."""
    B, S, E = token_embs_e.shape

    def kernel(pos_ref, valid_ref, did_ref, tok_ref, att_ref, emb_ref, ctx_ref):
        n = pl.program_id(0)
        m_run = jnp.full((1, E), SMALL_NEGATIVE, jnp.float32)
        l_run = jnp.zeros((1, E), jnp.float32)
        a_run = jnp.zeros((1, S), jnp.float32)
        for j in range(max_ment):         # max_ment is small & static -> unrolled
            p = pos_ref[n * max_ment + j]
            valid = valid_ref[n * max_ment + j] > 0
            row = tok_ref[0, pl.ds(p, 1), :]                        # (1, E)
            row = jnp.where(valid, row, jnp.full_like(row, SMALL_NEGATIVE))
            m_new = jnp.maximum(m_run, row)                         # online logsumexp
            l_run = l_run * jnp.exp(m_run - m_new) + jnp.exp(row - m_new)
            m_run = m_new
            a_run = a_run + att_ref[0, pl.ds(p, 1), :] * valid.astype(jnp.float32)
        emb_ref[pl.ds(n, 1), :] = m_run + jnp.log(l_run)
        ctx_ref[pl.ds(n, 1), :] = jnp.dot(a_run.astype(jnp.bfloat16),
                                          tok_ref[0].astype(jnp.bfloat16),
                                          preferred_element_type=jnp.float32)

    grid_spec = pltpu.PrefetchScalarGridSpec(
        num_scalar_prefetch=3,
        grid=(n_ent,),
        in_specs=[
            pl.BlockSpec((1, S, E), lambda n, pos, valid, did: (did[n], 0, 0)),
            pl.BlockSpec((1, S, S), lambda n, pos, valid, did: (did[n], 0, 0)),
        ],
        out_specs=(
            # Full-array output blocks stay resident in VMEM for the whole grid;
            # each grid step writes exactly one row via a dynamic slice.
            pl.BlockSpec((n_ent, E), lambda n, pos, valid, did: (0, 0)),
            pl.BlockSpec((n_ent, E), lambda n, pos, valid, did: (0, 0)),
        ),
    )
    return pl.pallas_call(
        kernel,
        out_shape=(jax.ShapeDtypeStruct((n_ent, E), jnp.float32),
                   jax.ShapeDtypeStruct((n_ent, E), jnp.float32)),
        grid_spec=grid_spec,
        compiler_params=_compiler_params(("arbitrary",)),
    )(pos_flat, valid_flat, ent_did, token_embs_e, att_mean)


# ------------------------------ forward pass ------------------------------

def forward(params, inputs):
    # TODO(synk): Transformer backbone is undefined in the reference; its outputs
    # (token embeddings + attention maps) are taken as inputs here.
    token_embs = inputs['token_embs']                    # (B, S, HIDDEN)
    token_atts = inputs['token_atts']                    # (B, H, S, S)
    start_mpos = inputs['start_mpos']                    # (N_ent, max_ment), -1 padded
    num_ment = inputs['num_mention_per_entity']          # (N_ent,) float
    ent_did = inputs['ent_did'].astype(jnp.int32)        # (N_ent,) doc id per entity
    head_ents = inputs['head_entities']                  # (P,) doc-local indices
    tail_ents = inputs['tail_entities']                  # (P,)
    offsets = inputs['offsets']                          # (P,) cumulative entity offsets

    B, S, HD = token_embs.shape
    E = params['extractor_w'].shape[1]
    n_ent, max_ment = start_mpos.shape

    # extractor_trans: Linear(hidden_dim -> emb_size)                  [Pallas, MXU]
    token_embs_e = pallas_linear(token_embs.reshape(B * S, HD),
                                 params['extractor_w'],
                                 params['extractor_b']).reshape(B, S, E)

    # Head-mean of the attention maps.  This commutes with the per-mention sum
    # and the 1/(n_mention+1e-5) scaling applied later, and avoids materializing
    # the padded / gathered (N_ent, max_ment, H, S) tensor of the reference.
    att_mean = jnp.mean(token_atts, axis=1)              # (B, S, S)

    pos_flat = jnp.maximum(start_mpos, 0).astype(jnp.int32).reshape(-1)
    valid_flat = (start_mpos >= 0).astype(jnp.int32).reshape(-1)

    # compute_entity_embs (logsumexp over mentions) + entity attention context,
    # fused and scalar-prefetch driven                                 [Pallas]
    entity_embs, ctx_raw = pallas_entity_pool(
        token_embs_e, att_mean, pos_flat, valid_flat, ent_did, n_ent, max_ment)
    ent_ctx = ctx_raw / (num_ment[:, None] + 1e-5)       # (N_ent, E)

    # TODO(synk): mention/sentence nodes, graph edges and the RGCN are undefined
    # in the reference; the RGCN is treated as identity over the entity nodes.
    gcn_first = entity_embs
    gcn_last = entity_embs

    hg = head_ents + offsets                             # global head entity ids
    tg = tail_ents + offsets                             # global tail entity ids

    # relation_map[did, :, h, t] == gcn_last[hg] * gcn_last[tg]; with the CNN
    # stand-in being identity, the O(B*E*max_e^2) map is never materialized.
    # TODO(synk): CNN(emb_size) is undefined in the reference; if it becomes real,
    # build a lane-dense (B, max_e, max_e, E) relation map here instead.
    relation = gcn_last[hg] * gcn_last[tg]               # (P, E)

    # ht_extractor: Linear(4E -> 2E) on concatenated head/tail nodes   [Pallas, MXU]
    gcn_cat = jnp.concatenate([gcn_first, gcn_last], axis=-1)          # (N_ent, 2E)
    entity_ht = pallas_linear(
        jnp.concatenate([gcn_cat[hg], gcn_cat[tg]], axis=-1),
        params['ht_w'], params['ht_b'])                  # (P, 2E)

    # entity attention-weighted context per pair
    e_tw = jnp.concatenate([ent_ctx[hg], ent_ctx[tg]], axis=-1)        # (P, 2E)

    relation_rep = jnp.concatenate([relation, e_tw, entity_ht], axis=-1)  # (P, 5E)

    # MIP_Linear + tanh + bilinear classifier (fused, lane-padded out) [Pallas, MXU]
    logits = pallas_mip_head(relation_rep, params['mip_w'], params['mip_b'],
                             params['bil_w'], params['bil_b'])

    # TODO(synk): Loss.AT_pred / AT_loss / SC / PSD losses are undefined in the
    # reference; the eval path here returns the raw logits.
    return logits


# ---------------------------------- main ----------------------------------

if __name__ == "__main__":
    B, S, HIDDEN, EMB, HEADS, NUM_REL = 2, 16, 32, 32, 4, 4

    key = jax.random.PRNGKey(0)
    keys = jax.random.split(key, 10)

    def init_linear(kw, kb, din, dout):
        return (jax.random.normal(kw, (din, dout), jnp.float32) * 0.02,
                jax.random.normal(kb, (dout,), jnp.float32) * 0.02)

    params = {}
    params['extractor_w'], params['extractor_b'] = init_linear(keys[0], keys[1], HIDDEN, EMB)
    params['ht_w'], params['ht_b'] = init_linear(keys[2], keys[3], 4 * EMB, 2 * EMB)
    params['mip_w'], params['mip_b'] = init_linear(keys[4], keys[5], 5 * EMB, 2 * EMB)
    params['bil_w'], params['bil_b'] = init_linear(keys[6], keys[7], 2 * EMB, NUM_REL)

    # synthetic "transformer" outputs
    token_embs = jax.random.normal(keys[8], (B, S, HIDDEN), jnp.float32)
    token_atts = jax.nn.softmax(
        jax.random.normal(keys[9], (B, HEADS, S, S), jnp.float32), axis=-1)

    # synthetic document structure: doc0 has 3 entities, doc1 has 2
    num_entity_per_doc = np.array([3, 2])
    ent_did = jnp.array(np.repeat(np.arange(B), num_entity_per_doc), jnp.int32)

    # mention start positions per entity, -1 padded (max 2 mentions per entity)
    start_mpos = jnp.array([[1, 4], [6, -1], [9, 12], [0, 3], [7, -1]], jnp.int32)
    num_mention_per_entity = jnp.array([2.0, 1.0, 2.0, 2.0, 1.0], jnp.float32)

    # entity pairs: doc0 -> (0,1), (1,2); doc1 -> (0,1)
    head_entities = jnp.array([0, 1, 0], jnp.int32)
    tail_entities = jnp.array([1, 2, 1], jnp.int32)
    offsets = jnp.array([0, 0, 3], jnp.int32)  # cumsum of num_entity_per_doc per pair

    inputs = dict(token_embs=token_embs, token_atts=token_atts,
                  start_mpos=start_mpos,
                  num_mention_per_entity=num_mention_per_entity,
                  ent_did=ent_did, head_entities=head_entities,
                  tail_entities=tail_entities, offsets=offsets)

    logits = forward(params, inputs)
    jax.block_until_ready(logits)
    assert logits.shape == (3, NUM_REL)
    assert bool(jnp.all(jnp.isfinite(logits)))
    print("KERNEL_OK")
</pallas_src>

<mosaic_0001>
module attributes {stable_mosaic.version = 11 : i64} {
  func.func @_linear_kernel(%arg0: i32, %arg1: memref<32x32xf32, #tpu.memory_space<vmem>>, %arg2: memref<32x32xf32, #tpu.memory_space<vmem>>, %arg3: memref<1x32xf32, #tpu.memory_space<vmem>>, %arg4: memref<32x32xf32, #tpu.memory_space<vmem>>) attributes {dimension_semantics = [#tpu.dimension_semantics<parallel>], iteration_bounds = array<i64: 1>, scalar_prefetch = 0 : i64, scratch_operands = 0 : i64, tpu.core_type = #tpu.core_type<tc>, window_params = [{transform_indices = @transform_0, window_bounds = array<i64: 32, 32>}, {pipeline_mode = #tpu.pipeline_mode<synchronous>, transform_indices = @transform_1, window_bounds = array<i64: 32, 32>}, {pipeline_mode = #tpu.pipeline_mode<synchronous>, transform_indices = @transform_2, window_bounds = array<i64: 1, 32>}, {transform_indices = @transform_3, window_bounds = array<i64: 32, 32>}]} {
    %c0 = arith.constant 0 : index
    %c0_0 = arith.constant 0 : index
    %0 = vector.load %arg1[%c0, %c0_0] : memref<32x32xf32, #tpu.memory_space<vmem>>, vector<32x32xf32>
    %1 = arith.truncf %0 : vector<32x32xf32> to vector<32x32xbf16>
    %c0_1 = arith.constant 0 : index
    %c0_2 = arith.constant 0 : index
    %2 = vector.load %arg2[%c0_1, %c0_2] : memref<32x32xf32, #tpu.memory_space<vmem>>, vector<32x32xf32>
    %3 = arith.truncf %2 : vector<32x32xf32> to vector<32x32xbf16>
    %cst = arith.constant dense<0.000000e+00> : vector<32x32xf32>
    %4 = tpu.matmul %1, %3, %cst {dimension_numbers = #tpu.dot_dimension_numbers<[1], [0], [0], [1], [0, 0, 1, 1], [], []>} : vector<32x32xbf16>, vector<32x32xbf16>, vector<32x32xf32> -> vector<32x32xf32>
    %c0_3 = arith.constant 0 : index
    %c0_4 = arith.constant 0 : index
    %5 = vector.load %arg3[%c0_3, %c0_4] : memref<1x32xf32, #tpu.memory_space<vmem>>, vector<1x32xf32>
    %6 = vector.broadcast %5 : vector<1x32xf32> to vector<32x32xf32>
    %7 = arith.addf %4, %6 : vector<32x32xf32>
    %c0_5 = arith.constant 0 : index
    %c0_6 = arith.constant 0 : index
    %8 = vector.load %arg4[%c0_5, %c0_6] : memref<32x32xf32, #tpu.memory_space<vmem>>, vector<32x32xf32>
    tpu.vector_store %arg4[%c0_5, %c0_6], %7 {strides = array<i32>} : memref<32x32xf32, #tpu.memory_space<vmem>>, vector<32x32xf32>,
    return
  }
  func.func @transform_0(%arg0: i32) -> (i32, i32) {
    %c0_i32 = arith.constant 0 : i32
    %c0_i32_0 = arith.constant 0 : i32
    return %arg0, %c0_i32 : i32, i32
  }
  func.func @transform_1(%arg0: i32) -> (i32, i32) {
    %c0_i32 = arith.constant 0 : i32
    %c0_i32_0 = arith.constant 0 : i32
    %c0_i32_1 = arith.constant 0 : i32
    return %c0_i32, %c0_i32_0 : i32, i32
  }
  func.func @transform_2(%arg0: i32) -> (i32, i32) {
    %c0_i32 = arith.constant 0 : i32
    %c0_i32_0 = arith.constant 0 : i32
    %c0_i32_1 = arith.constant 0 : i32
    return %c0_i32, %c0_i32_0 : i32, i32
  }
  func.func @transform_3(%arg0: i32) -> (i32, i32) {
    %c0_i32 = arith.constant 0 : i32
    %c0_i32_0 = arith.constant 0 : i32
    return %arg0, %c0_i32 : i32, i32
  }
}

</mosaic_0001>

<bundles_post_ra>
// kernel: tpu_custom_call.1
= control target key start
LH: loop header
LB: loop body
LE: loop exit
PB: predicated region body
PF: predicated region fallthrough
CT: control target
= control target key end

     0   :  { %8 = vsyncpa [#allocation3], 0  ;;  %s254_s0 = inlined_call_operand.hbm [shape: f32[32,32], index: 0, kind: input, shape index: {}]   ;;  %s255_s1 = inlined_call_operand.hbm [shape: f32[32,32], index: 1, kind: input, shape index: {}]   ;;  %s256_s2 = inlined_call_operand.vmem [shape: f32[1,32], index: 2, kind: input, shape index: {}]   ;;  %s257_s3 = inlined_call_operand.hbm [shape: f32[32,32], index: 3, kind: output, shape index: {}]  }
   0x1   :  { %9 = vsyncpa [#allocation6], 0 }
   0x2   :  { %10 = vsyncpa [#allocation4], 0  ;;  %s15_s14 = sshll.u32 %s254_s0, 4  ;;  %s202_s15 = smov [#allocation2]   ;;  %s16_s14 = int_to_ptr.hbm [resolvable:$true] %s15_s14 }
   0x3   :  { %s17_s16 = sshll.u32 %s202_s15, 4  ;;  %s28_s19 = sshll.u32 %s255_s1, 4  ;;  %s18_s16 = int_to_ptr.vmem [resolvable:$true] %s17_s16  ;;  %s29_s19 = int_to_ptr.hbm [resolvable:$true] %s28_s19 }
   0x4   :  { %s203_s20 = smov 128   ;;  %s204_s21 = smov 8  }
   0x5   :  { %23 = dma.hbm_to_vmem [thread:$0]  %s16_s14, 512, %s18_s16, [#allocation3], %s203_s20, %s203_s20, %s204_s21  }
   0x6   :  { %s205_s22 = smov [#allocation5]  }
   0x7   :  { %s30_s23 = sshll.u32 %s205_s22, 4  ;;  %s31_s23 = int_to_ptr.vmem [resolvable:$true] %s30_s23 }
   0x8   :  { %36 = dma.hbm_to_vmem [thread:$0]  %s29_s19, 512, %s31_s23, [#allocation6], %s203_s20, %s203_s20, %s204_s21  }
   0x9   :  { %196 = dma.done.wait [#allocation3], 512  }
   0xa   :  { %197 = vsyncadd [#allocation3], 4294966784 }
   0xb   :  { %198 = dma.done.wait [#allocation6], 512  }
   0xc   :  { %199 = vsyncadd [#allocation6], 4294966784  ;;  %v56_v0 = vld [vmem:[#allocation5 + $0x10] sm:$0xff]  ;;  %v57_v1 = vld [vmem:[#allocation5 + $0x18] sm:$0xff]  ;;  %vm64_vm0 = vcmask 261120   ;;  %s206_s24 = smov [#allocation7]  }
   0xd   :  { %v54_v2 = vld [vmem:[#allocation5] sm:$0xff]  ;;  %v59_v3 = vpack.c.bf16 %v57_v1, %v56_v0  ;;  %v55_v4 = vld [vmem:[#allocation5 + $0x8] sm:$0xff]  ;;  %v50_v8 = vld [vmem:[#allocation2 + $0x10] sm:$0xff]  ;;  %s98_s25 = sshll.u32 %s206_s24, 4  ;;  %s100_s28 = sshll.u32 %s257_s3, 4  ;;  %s99_s25 = int_to_ptr.vmem [resolvable:$true] %s98_s25  ;;  %s101_s28 = int_to_ptr.hbm [resolvable:$true] %s100_s28 }
   0xe   :  { %v48_v5 = vld [vmem:[#allocation2] sm:$0xff]  ;;  %v58_v6 = vpack.c.bf16 %v55_v4, %v54_v2  ;;  %v49_v7 = vld [vmem:[#allocation2 + $0x8] sm:$0xff]  ;;  %v51_v9 = vld [vmem:[#allocation2 + $0x18] sm:$0xff] }
   0xf   :  { %77 = vmatpush.bf16.msra.mxu0 %v59_v3  ;;  %116 = vmatpush.bf16.msra.mxu1 %v59_v3  ;;  %v52_v10 = vpack.c.bf16 %v49_v7, %v48_v5  ;;  %v53_v11 = vpack.c.bf16 %v51_v9, %v50_v8  ;;  %v123_v12 = vld [vmem:[%s256_s2] ss:$0 sm:$0xff] }
  0x13   :  { %78 = vmatpush.bf16.msra.mxu0 %v58_v6  ;;  %117 = vmatpush.bf16.msra.mxu1 %v58_v6 }
  0x16   :  { %114 = vmatmul.msk.bf16.vlgmr.msra.gmra.mxu0 %vm64_vm0, %v52_v10  ;;  %115 = vmatmul.msk.bf16.vlgmr.msra.gmra.mxu1 %vm64_vm0, %v53_v11 }
  0x93   :  { %v80_v13 = vpop.f32.mrf.mxu0  ;;  %v85_v14 = vpop.f32.mrf.mxu1 }
  0x94   :  { %v81_v15 = vadd.f32 %v123_v12, %v80_v13  ;;  %v86_v16 = vadd.f32 %v123_v12, %v85_v14 }
  0x96   :  { %90 = vst.msk [vmem:[#allocation7] sm:$0xff] %vm64_vm0, %v81_v15 }
  0x97   :  { %92 = vst.msk [vmem:[#allocation7 + $0x10] sm:$0xff] %vm64_vm0, %v86_v16 }
  0x9b   :  { %v82_v17 = vpop.f32.mrf.mxu0  ;;  %v87_v18 = vpop.f32.mrf.mxu1 }
  0x9c   :  { %v83_v19 = vadd.f32 %v123_v12, %v82_v17  ;;  %v88_v20 = vadd.f32 %v123_v12, %v87_v18 }
  0x9e   :  { %91 = vst.msk [vmem:[#allocation7 + $0x8] sm:$0xff] %vm64_vm0, %v83_v19 }
  0x9f   :  { %93 = vst.msk [vmem:[#allocation7 + $0x18] sm:$0xff] %vm64_vm0, %v88_v20 }
  0xa0   :  { %106 = dma.vmem_to_hbm [thread:$0]  %s99_s25, 512, %s101_s28, [#allocation4], %s203_s20, %s203_s20, %s204_s21  }
  0xa1   :  { %200 = dma.done.wait [#allocation4], 512  }
  0xa2   :  { %201 = vsyncadd [#allocation4], 4294966784 }
  0xa3   :  { %111 = vsyncpa [#allocation3], 1 }
  0xa4   :  { %112 = vsyncpa [#allocation6], 1 }
  0xa5   :  { %113 = vsyncpa [#allocation4], 1 }

</bundles_post_ra>
